<compile_context>
chip_gen: v6e
topology: v6e:2x2x1
jax: 0.10.0
libtpu: 0.0.40
codegen_flags: <defaults>
</compile_context>

<pallas_src>
import functools

import jax
import jax.numpy as jnp
from jax import lax
from jax.experimental import pallas as pl
from jax.experimental.pallas import tpu as pltpu


# ---------------------------------------------------------------------------
# Hardware-aware sizing helpers
# ---------------------------------------------------------------------------
@functools.lru_cache(maxsize=1)
def _tpu_generation() -> int:
    try:
        kind = jax.devices()[0].device_kind.lower()
    except Exception:
        return 6
    for g in (7, 6, 5, 4):
        if f"v{g}" in kind:
            return g
    return 6


def _vmem_plan(gen):
    """(per-step block budget bytes, vmem_limit_bytes) per TPU generation."""
    if gen >= 7:                      # v7x: 64 MiB VMEM per TensorCore
        return 24 * 1024 * 1024, 48 * 1024 * 1024
    # v5e / v6e: 128 MiB physical VMEM; scoped default is only 16/32 MiB,
    # so the explicit limit is mandatory (especially on v5e).
    return 48 * 1024 * 1024, 100 * 1024 * 1024


def _block_bytes(n, tc, tl, itemsize):
    """Pipelined working set of one grid step (dtype-aware): xr/xi/or/oi
    double-buffered I/O blocks plus f32 temporaries of the stats pass."""
    io = 4 * 2 * n * tc * tl * itemsize
    tmp = 3 * n * tc * tl * 4
    return io + tmp


def _choose_tc_3d(n, c, l, itemsize, budget, gen):
    """Channel tile for the single-pass (N, TC, L) kernel, or None if even the
    smallest legal channel tile blows the budget (-> two-pass L-split path)."""
    min_tc = c if c < 8 else 8
    if _block_bytes(n, min_tc, l, itemsize) > budget:
        return None
    per_c = max(_block_bytes(n, 1, l, itemsize), 1)
    tc = budget // per_c
    if tc >= c:
        tc = c
    else:
        tc = min(c, max(8, (tc // 8) * 8))
    if gen >= 7 and c >= 16:
        # Guarantee >=2 grid steps so the single "parallel" axis can shard
        # across v7x's two TensorCores.
        half = ((c + 1) // 2 + 7) // 8 * 8
        tc = min(tc, half)
    return tc


def _choose_tc_2d(n, c, itemsize, budget, gen):
    """Lane-axis channel tile for the 2-D (N, C) path (multiple of 128)."""
    def bb(tc):
        return 4 * 2 * n * tc * itemsize + 3 * n * tc * 4
    if bb(c) <= budget:
        tc = c
    else:
        tc = (budget // max(bb(1), 1) // 128) * 128
        tc = min(c, max(128, tc))
        # TODO(synk): also split the batch axis if a single (N, 128) block
        # still exceeds the VMEM limit for extremely large N.
    if gen >= 7 and c >= 256 and tc >= c:
        tc = min(tc, ((c + 1) // 2 + 127) // 128 * 128)
    return tc


def _choose_fallback_tiles(n, c, l, itemsize, budget):
    """(TC, TL) for the two-pass small-C / huge-N*L path."""
    tc = c if c < 8 else 8
    per_l = max(_block_bytes(n, tc, 1, itemsize), 1)
    tl = (budget // per_l // 128) * 128
    tl = min(l, max(128, tl))
    # TODO(synk): also split the batch axis when a single (N, tc, 128) block
    # still exceeds the VMEM limit (tiny L, enormous N).
    return tc, tl


# ---------------------------------------------------------------------------
# Kernels
# ---------------------------------------------------------------------------
def _make_bn3d_kernel(eps, ew_dtype):
    """Single-pass BN over an (N, TC, L) block: fused sum/sumsq stats in f32,
    gamma folded into scale, normalize re-reads the VMEM-resident block."""

    def _bn_block(x_ref, g_ref, b_ref, o_ref):
        x32 = x_ref[...].astype(jnp.float32)                 # stats pass only
        n_elems = x32.shape[0] * x32.shape[2]
        inv_n = jnp.float32(1.0 / n_elems)
        s1 = jnp.sum(jnp.sum(x32, axis=0, keepdims=True), axis=2, keepdims=True)
        s2 = jnp.sum(jnp.sum(x32 * x32, axis=0, keepdims=True), axis=2,
                     keepdims=True)
        mean = s1 * inv_n                                     # (1, TC, 1)
        # NOTE: E[x^2]-mean^2 can lose precision when |mean| >> std; clamped.
        var = jnp.maximum(s2 * inv_n - mean * mean, 0.0)      # biased variance
        inv = lax.rsqrt(var + jnp.float32(eps))               # EUP op
        g = g_ref[...].astype(jnp.float32)[jnp.newaxis]       # (1, TC, 1)
        b = b_ref[...].astype(jnp.float32)[jnp.newaxis]
        scale32 = inv * g
        shift32 = b - mean * scale32
        scale = scale32.astype(ew_dtype)
        shift = shift32.astype(ew_dtype)
        # Re-index the ref (block is VMEM-resident) instead of keeping the
        # full-block f32 upcast live across the stats pass.
        o_ref[...] = (x_ref[...].astype(ew_dtype) * scale + shift
                      ).astype(o_ref.dtype)

    def kernel(xr_ref, xi_ref, gr_ref, br_ref, gi_ref, bi_ref, or_ref, oi_ref):
        _bn_block(xr_ref, gr_ref, br_ref, or_ref)   # bn_r(input_r)
        _bn_block(xi_ref, gi_ref, bi_ref, oi_ref)   # bn_i(input_i)

    return kernel


def _make_bn2d_kernel(eps, ew_dtype):
    """Lane-dense path for (N, C) inputs: C on the lane axis, stats reduced
    over the sublane (batch) axis, scale/shift broadcast along sublanes."""

    def _bn_block(x_ref, g_ref, b_ref, o_ref):
        x32 = x_ref[...].astype(jnp.float32)                  # (N, TC)
        inv_n = jnp.float32(1.0 / x32.shape[0])
        s1 = jnp.sum(x32, axis=0, keepdims=True)              # (1, TC)
        s2 = jnp.sum(x32 * x32, axis=0, keepdims=True)
        mean = s1 * inv_n
        var = jnp.maximum(s2 * inv_n - mean * mean, 0.0)
        inv = lax.rsqrt(var + jnp.float32(eps))
        g = g_ref[...].astype(jnp.float32)
        b = b_ref[...].astype(jnp.float32)
        scale32 = inv * g
        shift32 = b - mean * scale32
        scale = scale32.astype(ew_dtype)
        shift = shift32.astype(ew_dtype)
        o_ref[...] = (x_ref[...].astype(ew_dtype) * scale + shift
                      ).astype(o_ref.dtype)

    def kernel(xr_ref, xi_ref, gr_ref, br_ref, gi_ref, bi_ref, or_ref, oi_ref):
        _bn_block(xr_ref, gr_ref, br_ref, or_ref)
        _bn_block(xi_ref, gi_ref, bi_ref, oi_ref)

    return kernel


def _make_stats_kernel(l_total, tl):
    """Fallback pass 1: accumulate per-channel sum / sumsq over L chunks."""
    needs_mask = (l_total % tl) != 0

    def _accum(x_ref, s1_ref, s2_ref, l_idx):
        x = x_ref[...].astype(jnp.float32)                 # (N, TC, TL)
        if needs_mask:
            lane = lax.broadcasted_iota(jnp.int32, x.shape, 2) + l_idx * tl
            x = jnp.where(lane < l_total, x, 0.0)
        ps1 = jnp.sum(jnp.sum(x, axis=0), axis=-1, keepdims=True)       # (TC,1)
        ps2 = jnp.sum(jnp.sum(x * x, axis=0), axis=-1, keepdims=True)

        @pl.when(l_idx == 0)
        def _():
            s1_ref[...] = jnp.zeros_like(s1_ref)
            s2_ref[...] = jnp.zeros_like(s2_ref)

        s1_ref[...] += ps1
        s2_ref[...] += ps2

    def kernel(xr_ref, xi_ref, s1r_ref, s2r_ref, s1i_ref, s2i_ref):
        l_idx = pl.program_id(1)
        _accum(xr_ref, s1r_ref, s2r_ref, l_idx)
        _accum(xi_ref, s1i_ref, s2i_ref, l_idx)

    return kernel


def _make_apply_kernel(ew_dtype):
    """Fallback pass 2: apply precomputed per-channel scale / shift."""

    def _apply(x_ref, sc_ref, sh_ref, o_ref):
        sc = sc_ref[...].astype(ew_dtype)[jnp.newaxis]     # (1, TC, 1)
        sh = sh_ref[...].astype(ew_dtype)[jnp.newaxis]
        o_ref[...] = (x_ref[...].astype(ew_dtype) * sc + sh).astype(o_ref.dtype)

    def kernel(xr_ref, xi_ref, scr_ref, shr_ref, sci_ref, shi_ref,
               or_ref, oi_ref):
        _apply(xr_ref, scr_ref, shr_ref, or_ref)
        _apply(xi_ref, sci_ref, shi_ref, oi_ref)

    return kernel


# ---------------------------------------------------------------------------
# Two-pass fallback (small C, huge N*L)
# ---------------------------------------------------------------------------
def _bn3d_two_pass(x_r, x_i, gr2, br2, gi2, bi2, eps, ew_dtype, budget,
                   vmem_limit):
    n, c, l = x_r.shape
    itemsize = x_r.dtype.itemsize
    tc, tl = _choose_fallback_tiles(n, c, l, itemsize, budget)
    nc, nl = pl.cdiv(c, tc), pl.cdiv(l, tl)

    x_spec = pl.BlockSpec((n, tc, tl), lambda ci, li: (0, ci, li))
    stat_spec = pl.BlockSpec((tc, 1), lambda ci, li: (ci, 0))
    stat_shape = jax.ShapeDtypeStruct((c, 1), jnp.float32)
    bytes_x = n * c * l * itemsize

    s1r, s2r, s1i, s2i = pl.pallas_call(
        _make_stats_kernel(l, tl),
        out_shape=(stat_shape,) * 4,
        grid=(nc, nl),
        in_specs=[x_spec, x_spec],
        out_specs=(stat_spec,) * 4,
        compiler_params=pltpu.CompilerParams(
            dimension_semantics=("parallel", "arbitrary"),
            vmem_limit_bytes=vmem_limit),
        cost_estimate=pl.CostEstimate(
            flops=int(6 * n * c * l), transcendentals=0,
            bytes_accessed=int(2 * bytes_x)),
    )(x_r, x_i)

    inv_n = jnp.float32(1.0 / (n * l))

    def fold(s1, s2, g2, b2):
        mean = s1 * inv_n
        var = jnp.maximum(s2 * inv_n - mean * mean, 0.0)
        scale = lax.rsqrt(var + jnp.float32(eps)) * g2
        shift = b2 - mean * scale
        return scale, shift

    scr, shr = fold(s1r, s2r, gr2, br2)
    sci, shi = fold(s1i, s2i, gi2, bi2)

    out_r, out_i = pl.pallas_call(
        _make_apply_kernel(ew_dtype),
        out_shape=(jax.ShapeDtypeStruct((n, c, l), x_r.dtype),
                   jax.ShapeDtypeStruct((n, c, l), x_i.dtype)),
        grid=(nc, nl),
        in_specs=[x_spec, x_spec, stat_spec, stat_spec, stat_spec, stat_spec],
        out_specs=(x_spec, x_spec),
        compiler_params=pltpu.CompilerParams(
            dimension_semantics=("parallel", "parallel"),
            vmem_limit_bytes=vmem_limit),
        cost_estimate=pl.CostEstimate(
            flops=int(4 * n * c * l), transcendentals=0,
            bytes_accessed=int(4 * bytes_x)),
    )(x_r, x_i, scr, shr, sci, shi)
    return out_r, out_i


# ---------------------------------------------------------------------------
# Public wrapper
# ---------------------------------------------------------------------------
@functools.partial(jax.jit, static_argnames=("eps",))
def naive_complex_batchnorm1d(x_r, x_i, gamma_r, beta_r, gamma_i, beta_i,
                              eps=1e-5):
    """Forward of NaiveComplexBatchNorm1d (training-mode batch statistics).

    x_r, x_i: (N, C, L) or (N, C); gammas/betas: (C,).
    Returns (out_r, out_i) with the same shape/dtype as the inputs.
    """
    # TODO(synk): running-mean/var + momentum tracking (eval mode) is not
    # implemented; training-mode normalization is identical without it.
    gen = _tpu_generation()
    budget, vmem_limit = _vmem_plan(gen)
    # bf16 elementwise path only where the VPU has bf16 (v6e / v7x).
    ew_dtype = (jnp.bfloat16
                if (x_r.dtype == jnp.bfloat16 and gen >= 6) else jnp.float32)
    itemsize = x_r.dtype.itemsize

    if x_r.ndim == 2:
        # Lane-dense 2-D path: C on the lane axis (no trailing L=1 dim).
        n, c = x_r.shape
        tc = _choose_tc_2d(n, c, itemsize, budget, gen)
        x_spec = pl.BlockSpec((n, tc), lambda ci: (0, ci))
        p_spec = pl.BlockSpec((1, tc), lambda ci: (0, ci))
        gr2 = gamma_r.reshape(1, c).astype(jnp.float32)
        br2 = beta_r.reshape(1, c).astype(jnp.float32)
        gi2 = gamma_i.reshape(1, c).astype(jnp.float32)
        bi2 = beta_i.reshape(1, c).astype(jnp.float32)
        bytes_x = n * c * itemsize
        return pl.pallas_call(
            _make_bn2d_kernel(eps, ew_dtype),
            out_shape=(jax.ShapeDtypeStruct((n, c), x_r.dtype),
                       jax.ShapeDtypeStruct((n, c), x_i.dtype)),
            grid=(pl.cdiv(c, tc),),
            in_specs=[x_spec, x_spec, p_spec, p_spec, p_spec, p_spec],
            out_specs=(x_spec, x_spec),
            compiler_params=pltpu.CompilerParams(
                dimension_semantics=("parallel",),
                vmem_limit_bytes=vmem_limit),
            cost_estimate=pl.CostEstimate(
                flops=int(10 * n * c), transcendentals=int(2 * c),
                bytes_accessed=int(4 * bytes_x)),
        )(x_r, x_i, gr2, br2, gi2, bi2)

    # 3-D (N, C, L) path.
    n, c, l = x_r.shape
    gr2 = gamma_r.reshape(c, 1).astype(jnp.float32)
    br2 = beta_r.reshape(c, 1).astype(jnp.float32)
    gi2 = gamma_i.reshape(c, 1).astype(jnp.float32)
    bi2 = beta_i.reshape(c, 1).astype(jnp.float32)

    tc = _choose_tc_3d(n, c, l, itemsize, budget, gen)
    if tc is None:
        # Small C with huge N*L: two-pass path with an L-chunk grid axis.
        return _bn3d_two_pass(x_r, x_i, gr2, br2, gi2, bi2, eps, ew_dtype,
                              budget, vmem_limit)

    x_spec = pl.BlockSpec((n, tc, l), lambda ci: (0, ci, 0))
    p_spec = pl.BlockSpec((tc, 1), lambda ci: (ci, 0))
    bytes_x = n * c * l * itemsize
    # TODO(synk): if L is not a multiple of 128, output stores are masked
    # (vst.msk); pad L upstream where the producer allows it.
    return pl.pallas_call(
        _make_bn3d_kernel(eps, ew_dtype),
        out_shape=(jax.ShapeDtypeStruct((n, c, l), x_r.dtype),
                   jax.ShapeDtypeStruct((n, c, l), x_i.dtype)),
        grid=(pl.cdiv(c, tc),),
        in_specs=[x_spec, x_spec, p_spec, p_spec, p_spec, p_spec],
        out_specs=(x_spec, x_spec),
        compiler_params=pltpu.CompilerParams(
            dimension_semantics=("parallel",),
            vmem_limit_bytes=vmem_limit),
        cost_estimate=pl.CostEstimate(
            flops=int(10 * n * c * l), transcendentals=int(2 * c),
            bytes_accessed=int(4 * bytes_x)),
    )(x_r, x_i, gr2, br2, gi2, bi2)


# ---------------------------------------------------------------------------
# Demo / correctness check
# ---------------------------------------------------------------------------
if __name__ == "__main__":
    N, C, L = 2, 4, 16
    key = jax.random.PRNGKey(0)
    kr, ki = jax.random.split(key)
    x_r = jax.random.normal(kr, (N, C, L), dtype=jnp.float32)
    x_i = jax.random.normal(ki, (N, C, L), dtype=jnp.float32)

    # nn.BatchNorm1d default affine init: weight=1, bias=0.
    gamma_r = jnp.ones((C,), jnp.float32)
    beta_r = jnp.zeros((C,), jnp.float32)
    gamma_i = jnp.ones((C,), jnp.float32)
    beta_i = jnp.zeros((C,), jnp.float32)

    def ref_bn(x, g, b, eps=1e-5):
        axes = (0, 2) if x.ndim == 3 else (0,)
        shape = [1] * x.ndim
        shape[1] = x.shape[1]
        mean = jnp.mean(x, axis=axes, keepdims=True)
        var = jnp.mean((x - mean) ** 2, axis=axes, keepdims=True)
        return (x - mean) / jnp.sqrt(var + eps) * g.reshape(shape) + b.reshape(shape)

    # 3-D (N, C, L) main path.
    out_r, out_i = naive_complex_batchnorm1d(
        x_r, x_i, gamma_r, beta_r, gamma_i, beta_i, eps=1e-5)
    jax.block_until_ready((out_r, out_i))
    assert jnp.allclose(out_r, ref_bn(x_r, gamma_r, beta_r), atol=1e-4, rtol=1e-4)
    assert jnp.allclose(out_i, ref_bn(x_i, gamma_i, beta_i), atol=1e-4, rtol=1e-4)

    # Lane-dense 2-D (N, C) path.
    x2_r, x2_i = x_r[:, :, 0], x_i[:, :, 0]
    o2_r, o2_i = naive_complex_batchnorm1d(
        x2_r, x2_i, gamma_r, beta_r, gamma_i, beta_i, eps=1e-5)
    jax.block_until_ready((o2_r, o2_i))
    assert jnp.allclose(o2_r, ref_bn(x2_r, gamma_r, beta_r), atol=1e-4, rtol=1e-4)
    assert jnp.allclose(o2_i, ref_bn(x2_i, gamma_i, beta_i), atol=1e-4, rtol=1e-4)

    # Two-pass fallback (forced small budget so the L axis is chunked + masked).
    Lf = 300
    kfr, kfi = jax.random.split(jax.random.PRNGKey(1))
    xf_r = jax.random.normal(kfr, (N, C, Lf), dtype=jnp.float32)
    xf_i = jax.random.normal(kfi, (N, C, Lf), dtype=jnp.float32)
    of_r, of_i = _bn3d_two_pass(
        xf_r, xf_i,
        gamma_r.reshape(C, 1), beta_r.reshape(C, 1),
        gamma_i.reshape(C, 1), beta_i.reshape(C, 1),
        1e-5, jnp.float32, 70_000, 64 * 1024 * 1024)
    jax.block_until_ready((of_r, of_i))
    assert jnp.allclose(of_r, ref_bn(xf_r, gamma_r, beta_r), atol=1e-4, rtol=1e-4)
    assert jnp.allclose(of_i, ref_bn(xf_i, gamma_i, beta_i), atol=1e-4, rtol=1e-4)

    print("KERNEL_OK")
</pallas_src>

<mosaic_0001>
module attributes {stable_mosaic.version = 11 : i64} {
  func.func @kernel(%arg0: i32, %arg1: memref<2x4x16xf32, #tpu.memory_space<vmem>>, %arg2: memref<2x4x16xf32, #tpu.memory_space<vmem>>, %arg3: memref<4x1xf32, #tpu.memory_space<vmem>>, %arg4: memref<4x1xf32, #tpu.memory_space<vmem>>, %arg5: memref<4x1xf32, #tpu.memory_space<vmem>>, %arg6: memref<4x1xf32, #tpu.memory_space<vmem>>, %arg7: memref<2x4x16xf32, #tpu.memory_space<vmem>>, %arg8: memref<2x4x16xf32, #tpu.memory_space<vmem>>) attributes {dimension_semantics = [#tpu.dimension_semantics<parallel>], iteration_bounds = array<i64: 1>, scalar_prefetch = 0 : i64, scratch_operands = 0 : i64, tpu.core_type = #tpu.core_type<tc>, window_params = [{transform_indices = @transform_0, window_bounds = array<i64: 2, 4, 16>}, {transform_indices = @transform_1, window_bounds = array<i64: 2, 4, 16>}, {transform_indices = @transform_2, window_bounds = array<i64: 4, 1>}, {transform_indices = @transform_3, window_bounds = array<i64: 4, 1>}, {transform_indices = @transform_4, window_bounds = array<i64: 4, 1>}, {transform_indices = @transform_5, window_bounds = array<i64: 4, 1>}, {transform_indices = @transform_6, window_bounds = array<i64: 2, 4, 16>}, {transform_indices = @transform_7, window_bounds = array<i64: 2, 4, 16>}]} {
    %c0 = arith.constant 0 : index
    %c0_0 = arith.constant 0 : index
    %c0_1 = arith.constant 0 : index
    %0 = vector.load %arg1[%c0, %c0_0, %c0_1] : memref<2x4x16xf32, #tpu.memory_space<vmem>>, vector<2x4x16xf32>
    %cst = arith.constant dense<0.000000e+00> : vector<4x16xf32>
    %1 = vector.multi_reduction <add>, %0, %cst [0] : vector<2x4x16xf32> to vector<4x16xf32>
    %2 = vector.shape_cast %1 : vector<4x16xf32> to vector<1x4x16xf32>
    %cst_2 = arith.constant dense<0.000000e+00> : vector<1x4xf32>
    %3 = vector.multi_reduction <add>, %2, %cst_2 [2] : vector<1x4x16xf32> to vector<1x4xf32>
    %4 = vector.shape_cast %3 : vector<1x4xf32> to vector<1x4x1xf32>
    %5 = arith.mulf %0, %0 : vector<2x4x16xf32>
    %cst_3 = arith.constant dense<0.000000e+00> : vector<4x16xf32>
    %6 = vector.multi_reduction <add>, %5, %cst_3 [0] : vector<2x4x16xf32> to vector<4x16xf32>
    %7 = vector.shape_cast %6 : vector<4x16xf32> to vector<1x4x16xf32>
    %cst_4 = arith.constant dense<0.000000e+00> : vector<1x4xf32>
    %8 = vector.multi_reduction <add>, %7, %cst_4 [2] : vector<1x4x16xf32> to vector<1x4xf32>
    %9 = vector.shape_cast %8 : vector<1x4xf32> to vector<1x4x1xf32>
    %cst_5 = arith.constant 3.125000e-02 : f32
    %10 = vector.broadcast %cst_5 : f32 to vector<1x4x1xf32>
    %11 = arith.mulf %4, %10 : vector<1x4x1xf32>
    %cst_6 = arith.constant 3.125000e-02 : f32
    %12 = vector.broadcast %cst_6 : f32 to vector<1x4x1xf32>
    %13 = arith.mulf %9, %12 : vector<1x4x1xf32>
    %14 = arith.mulf %11, %11 : vector<1x4x1xf32>
    %15 = arith.subf %13, %14 : vector<1x4x1xf32>
    %cst_7 = arith.constant 0.000000e+00 : f32
    %16 = vector.broadcast %cst_7 : f32 to vector<1x4x1xf32>
    %17 = arith.maximumf %15, %16 : vector<1x4x1xf32>
    %cst_8 = arith.constant 9.99999974E-6 : f32
    %18 = vector.broadcast %cst_8 : f32 to vector<1x4x1xf32>
    %19 = arith.addf %17, %18 : vector<1x4x1xf32>
    %20 = math.rsqrt %19 : vector<1x4x1xf32>
    %c0_9 = arith.constant 0 : index
    %c0_10 = arith.constant 0 : index
    %21 = vector.load %arg3[%c0_9, %c0_10] : memref<4x1xf32, #tpu.memory_space<vmem>>, vector<4x1xf32>
    %22 = vector.shape_cast %21 : vector<4x1xf32> to vector<1x4x1xf32>
    %c0_11 = arith.constant 0 : index
    %c0_12 = arith.constant 0 : index
    %23 = vector.load %arg4[%c0_11, %c0_12] : memref<4x1xf32, #tpu.memory_space<vmem>>, vector<4x1xf32>
    %24 = vector.shape_cast %23 : vector<4x1xf32> to vector<1x4x1xf32>
    %25 = arith.mulf %20, %22 : vector<1x4x1xf32>
    %26 = arith.mulf %11, %25 : vector<1x4x1xf32>
    %27 = arith.subf %24, %26 : vector<1x4x1xf32>
    %c0_13 = arith.constant 0 : index
    %c0_14 = arith.constant 0 : index
    %c0_15 = arith.constant 0 : index
    %28 = vector.load %arg1[%c0_13, %c0_14, %c0_15] : memref<2x4x16xf32, #tpu.memory_space<vmem>>, vector<2x4x16xf32>
    %29 = vector.broadcast %25 : vector<1x4x1xf32> to vector<2x4x16xf32>
    %30 = arith.mulf %28, %29 : vector<2x4x16xf32>
    %31 = vector.broadcast %27 : vector<1x4x1xf32> to vector<2x4x16xf32>
    %32 = arith.addf %30, %31 : vector<2x4x16xf32>
    %c0_16 = arith.constant 0 : index
    %c0_17 = arith.constant 0 : index
    %c0_18 = arith.constant 0 : index
    %33 = vector.load %arg7[%c0_16, %c0_17, %c0_18] : memref<2x4x16xf32, #tpu.memory_space<vmem>>, vector<2x4x16xf32>
    tpu.vector_store %arg7[%c0_16, %c0_17, %c0_18], %32 {strides = array<i32>} : memref<2x4x16xf32, #tpu.memory_space<vmem>>, vector<2x4x16xf32>,
    %c0_19 = arith.constant 0 : index
    %c0_20 = arith.constant 0 : index
    %c0_21 = arith.constant 0 : index
    %34 = vector.load %arg2[%c0_19, %c0_20, %c0_21] : memref<2x4x16xf32, #tpu.memory_space<vmem>>, vector<2x4x16xf32>
    %cst_22 = arith.constant dense<0.000000e+00> : vector<4x16xf32>
    %35 = vector.multi_reduction <add>, %34, %cst_22 [0] : vector<2x4x16xf32> to vector<4x16xf32>
    %36 = vector.shape_cast %35 : vector<4x16xf32> to vector<1x4x16xf32>
    %cst_23 = arith.constant dense<0.000000e+00> : vector<1x4xf32>
    %37 = vector.multi_reduction <add>, %36, %cst_23 [2] : vector<1x4x16xf32> to vector<1x4xf32>
    %38 = vector.shape_cast %37 : vector<1x4xf32> to vector<1x4x1xf32>
    %39 = arith.mulf %34, %34 : vector<2x4x16xf32>
    %cst_24 = arith.constant dense<0.000000e+00> : vector<4x16xf32>
    %40 = vector.multi_reduction <add>, %39, %cst_24 [0] : vector<2x4x16xf32> to vector<4x16xf32>
    %41 = vector.shape_cast %40 : vector<4x16xf32> to vector<1x4x16xf32>
    %cst_25 = arith.constant dense<0.000000e+00> : vector<1x4xf32>
    %42 = vector.multi_reduction <add>, %41, %cst_25 [2] : vector<1x4x16xf32> to vector<1x4xf32>
    %43 = vector.shape_cast %42 : vector<1x4xf32> to vector<1x4x1xf32>
    %cst_26 = arith.constant 3.125000e-02 : f32
    %44 = vector.broadcast %cst_26 : f32 to vector<1x4x1xf32>
    %45 = arith.mulf %38, %44 : vector<1x4x1xf32>
    %cst_27 = arith.constant 3.125000e-02 : f32
    %46 = vector.broadcast %cst_27 : f32 to vector<1x4x1xf32>
    %47 = arith.mulf %43, %46 : vector<1x4x1xf32>
    %48 = arith.mulf %45, %45 : vector<1x4x1xf32>
    %49 = arith.subf %47, %48 : vector<1x4x1xf32>
    %cst_28 = arith.constant 0.000000e+00 : f32
    %50 = vector.broadcast %cst_28 : f32 to vector<1x4x1xf32>
    %51 = arith.maximumf %49, %50 : vector<1x4x1xf32>
    %cst_29 = arith.constant 9.99999974E-6 : f32
    %52 = vector.broadcast %cst_29 : f32 to vector<1x4x1xf32>
    %53 = arith.addf %51, %52 : vector<1x4x1xf32>
    %54 = math.rsqrt %53 : vector<1x4x1xf32>
    %c0_30 = arith.constant 0 : index
    %c0_31 = arith.constant 0 : index
    %55 = vector.load %arg5[%c0_30, %c0_31] : memref<4x1xf32, #tpu.memory_space<vmem>>, vector<4x1xf32>
    %56 = vector.shape_cast %55 : vector<4x1xf32> to vector<1x4x1xf32>
    %c0_32 = arith.constant 0 : index
    %c0_33 = arith.constant 0 : index
    %57 = vector.load %arg6[%c0_32, %c0_33] : memref<4x1xf32, #tpu.memory_space<vmem>>, vector<4x1xf32>
    %58 = vector.shape_cast %57 : vector<4x1xf32> to vector<1x4x1xf32>
    %59 = arith.mulf %54, %56 : vector<1x4x1xf32>
    %60 = arith.mulf %45, %59 : vector<1x4x1xf32>
    %61 = arith.subf %58, %60 : vector<1x4x1xf32>
    %c0_34 = arith.constant 0 : index
    %c0_35 = arith.constant 0 : index
    %c0_36 = arith.constant 0 : index
    %62 = vector.load %arg2[%c0_34, %c0_35, %c0_36] : memref<2x4x16xf32, #tpu.memory_space<vmem>>, vector<2x4x16xf32>
    %63 = vector.broadcast %59 : vector<1x4x1xf32> to vector<2x4x16xf32>
    %64 = arith.mulf %62, %63 : vector<2x4x16xf32>
    %65 = vector.broadcast %61 : vector<1x4x1xf32> to vector<2x4x16xf32>
    %66 = arith.addf %64, %65 : vector<2x4x16xf32>
    %c0_37 = arith.constant 0 : index
    %c0_38 = arith.constant 0 : index
    %c0_39 = arith.constant 0 : index
    %67 = vector.load %arg8[%c0_37, %c0_38, %c0_39] : memref<2x4x16xf32, #tpu.memory_space<vmem>>, vector<2x4x16xf32>
    tpu.vector_store %arg8[%c0_37, %c0_38, %c0_39], %66 {strides = array<i32>} : memref<2x4x16xf32, #tpu.memory_space<vmem>>, vector<2x4x16xf32>,
    return
  }
  func.func @transform_0(%arg0: i32) -> (i32, i32, i32) {
    %c0_i32 = arith.constant 0 : i32
    %c0_i32_0 = arith.constant 0 : i32
    %c0_i32_1 = arith.constant 0 : i32
    return %c0_i32, %arg0, %c0_i32_0 : i32, i32, i32
  }
  func.func @transform_1(%arg0: i32) -> (i32, i32, i32) {
    %c0_i32 = arith.constant 0 : i32
    %c0_i32_0 = arith.constant 0 : i32
    %c0_i32_1 = arith.constant 0 : i32
    return %c0_i32, %arg0, %c0_i32_0 : i32, i32, i32
  }
  func.func @transform_2(%arg0: i32) -> (i32, i32) {
    %c0_i32 = arith.constant 0 : i32
    %c0_i32_0 = arith.constant 0 : i32
    return %arg0, %c0_i32 : i32, i32
  }
  func.func @transform_3(%arg0: i32) -> (i32, i32) {
    %c0_i32 = arith.constant 0 : i32
    %c0_i32_0 = arith.constant 0 : i32
    return %arg0, %c0_i32 : i32, i32
  }
  func.func @transform_4(%arg0: i32) -> (i32, i32) {
    %c0_i32 = arith.constant 0 : i32
    %c0_i32_0 = arith.constant 0 : i32
    return %arg0, %c0_i32 : i32, i32
  }
  func.func @transform_5(%arg0: i32) -> (i32, i32) {
    %c0_i32 = arith.constant 0 : i32
    %c0_i32_0 = arith.constant 0 : i32
    return %arg0, %c0_i32 : i32, i32
  }
  func.func @transform_6(%arg0: i32) -> (i32, i32, i32) {
    %c0_i32 = arith.constant 0 : i32
    %c0_i32_0 = arith.constant 0 : i32
    %c0_i32_1 = arith.constant 0 : i32
    return %c0_i32, %arg0, %c0_i32_0 : i32, i32, i32
  }
  func.func @transform_7(%arg0: i32) -> (i32, i32, i32) {
    %c0_i32 = arith.constant 0 : i32
    %c0_i32_0 = arith.constant 0 : i32
    %c0_i32_1 = arith.constant 0 : i32
    return %c0_i32, %arg0, %c0_i32_0 : i32, i32, i32
  }
}

</mosaic_0001>

<bundles_post_ra>
// kernel: naive_complex_batchnorm1d.1
= control target key start
LH: loop header
LB: loop body
LE: loop exit
PB: predicated region body
PF: predicated region fallthrough
CT: control target
= control target key end

     0   :  { %13 = vsyncpa [#allocation3], 0  ;;  %vm29_vm0 = vcmask 125952   ;;  %s318_s0 = inlined_call_operand.vmem [shape: f32[2,4,16], index: 0, kind: input, shape index: {}]   ;;  %s319_s1 = inlined_call_operand.vmem [shape: f32[2,4,16], index: 1, kind: input, shape index: {}]   ;;  %s320_s2 = inlined_call_operand.vmem [shape: f32[4,1], index: 2, kind: input, shape index: {}]   ;;  %s321_s3 = inlined_call_operand.vmem [shape: f32[4,1], index: 3, kind: input, shape index: {}]   ;;  %s322_s4 = inlined_call_operand.vmem [shape: f32[4,1], index: 4, kind: input, shape index: {}]   ;;  %s323_s5 = inlined_call_operand.vmem [shape: f32[4,1], index: 5, kind: input, shape index: {}]   ;;  %s324_s6 = inlined_call_operand.hbm [shape: f32[2,4,16], index: 6, kind: output, shape index: {0}]   ;;  %s325_s7 = inlined_call_operand.hbm [shape: f32[2,4,16], index: 7, kind: output, shape index: {1}]  }
   0x1   :  { %v251_v0 = vld [vmem:[%s318_s0] sm:$0xf]  ;;  %v256_v1 = vld [vmem:[%s318_s0 + $0x4] sm:$0xf] }
   0x2   :  { %v30_v2 = vsel %vm29_vm0, %v251_v0, 0.0  ;;  %v31_v3 = vsel %vm29_vm0, %v256_v1, 0.0  ;;  %v36_v4 = vmul.f32 %v251_v0, %v251_v0  ;;  %v37_v5 = vmul.f32 %v256_v1, %v256_v1  ;;  %v269_v6 = vld [vmem:[%s319_s1] sm:$0xf]  ;;  %v274_v7 = vld [vmem:[%s319_s1 + $0x4] sm:$0xf] }
   0x3   :  { %v32_v8 = vadd.f32 %v31_v3, %v30_v2  ;;  %v74_v9 = vsel %vm29_vm0, %v269_v6, 0.0  ;;  %v75_v10 = vsel %vm29_vm0, %v274_v7, 0.0  ;;  %v80_v11 = vmul.f32 %v269_v6, %v269_v6 }
   0x4   :  { %14 = vsyncpa [#allocation5], 0  ;;  %v38_v12 = vsel %vm29_vm0, %v36_v4, 0.0  ;;  %v39_v13 = vsel %vm29_vm0, %v37_v5, 0.0  ;;  %v76_v14 = vadd.f32 %v75_v10, %v74_v9  ;;  %v81_v15 = vmul.f32 %v274_v7, %v274_v7  ;;  %v51_v41 = vld [vmem:[%s320_s2] sm:$0xf] }
   0x5   :  { %v33_v16 = vsel %vm29_vm0, %v32_v8, 0.0  ;;  %v40_v17 = vadd.f32 %v39_v13, %v38_v12  ;;  %v82_v18 = vsel %vm29_vm0, %v80_v11, 0.0  ;;  %v203_v24 = vmov 0   ;;  %v95_v44 = vld [vmem:[%s322_s4] sm:$0xf]  ;;  %s204_s2 = smov [#allocation2]  }
   0x6   :  { %34 = vadd.xlane.f32.xlu0 %v33_v16  ;;  %v83_v19 = vsel %vm29_vm0, %v81_v15, 0.0  ;;  %v77_v21 = vsel %vm29_vm0, %v76_v14, 0.0  ;;  %154 = vset.pattern.permute.xlu1 %v203_v24  ;;  %v52_v48 = vld [vmem:[%s321_s3] sm:$0xf]  ;;  %s121_s4 = sshll.u32 %s204_s2, 4  ;;  %s205_s3 = smov [#allocation4]   ;;  %s122_s4 = int_to_ptr.vmem [resolvable:$true] %s121_s4 }
   0x7   :  { %v41_v20 = vsel %vm29_vm0, %v40_v17, 0.0  ;;  %v84_v22 = vadd.f32 %v83_v19, %v82_v18  ;;  %153 = vset.pattern.permute.xlu0 %v203_v24  ;;  %v96_v51 = vld [vmem:[%s323_s5] sm:$0xf]  ;;  %s133_s15 = sshll.u32 %s205_s3, 4  ;;  %s159_s5 = scalar_lea.vmem %s122_s4, 128  ;;  %s134_s15 = int_to_ptr.vmem [resolvable:$true] %s133_s15 }
   0x8   :  { %42 = vadd.xlane.f32.xlu1 %v41_v20  ;;  %p160_p0 = scmp.ne.s32.totalorder %s122_s4, %s159_s5  ;;  %p164_p1 = scmp.lt.s32.totalorder %s122_s4, %s122_s4 }
   0x9   :  { %v85_v23 = vsel %vm29_vm0, %v84_v22, 0.0  ;;  %p165_p2 = scmp.lt.s32.totalorder %s159_s5, %s159_s5 }
   0xa   :  { %78 = vadd.xlane.f32.xlu0 %v77_v21 }
   0xb   :  { %p166_p3 = por %p165_p2, %p164_p1 }
   0xc   :  { %86 = vadd.xlane.f32.xlu1 %v85_v23 }
   0xd   :  { %p167_p4 = pnand %p166_p3, %p160_p0 }
  0x8f   :  { %v35_v25 = vpop.xlane.xlu0 %34 }
  0x90   :  { %v44_v26 = vmul.f32 0.03125, %v35_v25 }
  0x91   :  { %v43_v27 = vpop.xlane.xlu1 %42 }
  0x92   :  { %v46_v28 = vmul.f32 %v44_v26, %v44_v26  ;;  %v45_v29 = vmul.f32 0.03125, %v43_v27 }
  0x93   :  { %v79_v30 = vpop.xlane.xlu0 %78 }
  0x94   :  { %v47_v31 = vsub.f32 %v45_v29, %v46_v28  ;;  %v88_v32 = vmul.f32 0.03125, %v79_v30 }
  0x95   :  { %v87_v33 = vpop.xlane.xlu1 %86 }
  0x96   :  { %v48_v34 = vmax.f32 %v47_v31, 0.0  ;;  %v90_v35 = vmul.f32 %v88_v32, %v88_v32  ;;  %v89_v36 = vmul.f32 0.03125, %v87_v33 }
  0x98   :  { %v49_v37 = vadd.f32 1e-05, %v48_v34  ;;  %v91_v38 = vsub.f32 %v89_v36, %v90_v35 }
  0x9a   :  { %155 = vrsqrt.f32 %v49_v37  ;;  %v92_v39 = vmax.f32 %v91_v38, 0.0 }
  0x9c   :  { %v93_v40 = vadd.f32 1e-05, %v92_v39 }
  0x9e   :  { %157 = vrsqrt.f32 %v93_v40 }
  0xa7   :  { %v156_v42 = vpop.eup %155 }
  0xa8   :  { %v53_v43 = vmul.f32 %v156_v42, %v51_v41 }
  0xaa   :  { %58 = vperm.xlu0 %153, %v53_v43   ;;  %v54_v47 = vmul.f32 %v53_v43, %v44_v26 }
  0xab   :  { %v158_v45 = vpop.eup %157 }
  0xac   :  { %v97_v46 = vmul.f32 %v158_v45, %v95_v44  ;;  %v55_v49 = vsub.f32 %v52_v48, %v54_v47 }
  0xae   :  { %102 = vperm.xlu1 %154, %v97_v46   ;;  %v98_v50 = vmul.f32 %v97_v46, %v88_v32 }
  0xb0   :  { %v99_v52 = vsub.f32 %v96_v51, %v98_v50 }
  0xb2   :  { %65 = vperm.xlu1 %154, %v55_v49  }
  0xb6   :  { %109 = vperm.xlu1 %154, %v99_v52  }
 0x125   :  { %v59_v53 = vpop.permute.xlu0 %58 }
 0x126   :  { %v61_v55 = vmul.f32 %v59_v53, %v251_v0  ;;  %v62_v56 = vmul.f32 %v59_v53, %v256_v1 }
 0x129   :  { %v103_v54 = vpop.permute.xlu1 %102 }
 0x12a   :  { %v105_v60 = vmul.f32 %v103_v54, %v269_v6  ;;  %v106_v61 = vmul.f32 %v103_v54, %v274_v7 }
 0x12d   :  { %v66_v57 = vpop.permute.xlu1 %65 }
 0x12e   :  { %v68_v58 = vadd.f32 %v66_v57, %v61_v55  ;;  %v69_v59 = vadd.f32 %v66_v57, %v62_v56 }
 0x130   :  { %70 = vst.msk [vmem:[#allocation2] sm:$0xf] %vm29_vm0, %v68_v58  ;;  %71 = vst.msk [vmem:[#allocation2 + $0x4] sm:$0xf] %vm29_vm0, %v69_v59 }
 0x131   :  { %v110_v62 = vpop.permute.xlu1 %109 }
 0x132   :  { %170 = shalt.err (!%p167_p4)
}
 0x133   :  { %s206_s16 = smov 64   ;;  %s207_s17 = smov 4   ;;  %v112_v63 = vadd.f32 %v110_v62, %v105_v60  ;;  %v113_v0 = vadd.f32 %v110_v62, %v106_v61 }
 0x134   :  { %127 = dma.vmem_to_hbm [thread:$0]  %s122_s4, 128, %s324_s6, [#allocation3], %s206_s16, %s206_s16, %s207_s17  }
 0x135   :  { %114 = vst.msk [vmem:[#allocation4] sm:$0xf] %vm29_vm0, %v112_v63  ;;  %115 = vst.msk [vmem:[#allocation4 + $0x4] sm:$0xf] %vm29_vm0, %v113_v0  ;;  %s179_s20 = scalar_lea.vmem %s134_s15, 128  ;;  %p184_p6 = scmp.lt.s32.totalorder %s134_s15, %s134_s15 }
 0x136   :  { %p180_p5 = scmp.ne.s32.totalorder %s134_s15, %s179_s20  ;;  %p185_p7 = scmp.lt.s32.totalorder %s179_s20, %s179_s20 }
 0x138   :  { %p186_p8 = por %p185_p7, %p184_p6 }
 0x13a   :  { %p187_p9 = pnand %p186_p8, %p180_p5 }
 0x13c   :  { %190 = shalt.err (!%p187_p9)
}
 0x13d   :  { %139 = dma.vmem_to_hbm [thread:$0]  %s134_s15, 128, %s325_s7, [#allocation5], %s206_s16, %s206_s16, %s207_s17  }
 0x13e   :  { %199 = dma.done.wait [#allocation3], 128  }
 0x13f   :  { %200 = vsyncadd [#allocation3], 4294967168 }
 0x140   :  { %201 = dma.done.wait [#allocation5], 128  }
 0x141   :  { %202 = vsyncadd [#allocation5], 4294967168 }
 0x142   :  { %146 = vsyncpa [#allocation3], 1 }
 0x143   :  { %147 = vsyncpa [#allocation5], 1 }

</bundles_post_ra>
